<compile_context>
chip_gen: v7x
topology: tpu7x:2x2x1
jax: 0.10.0
libtpu: 0.0.40
codegen_flags: <defaults>
</compile_context>

<pallas_src>
import math

import jax
import jax.numpy as jnp
from jax.experimental import pallas as pl
from jax.experimental.pallas import tpu as pltpu


def build_pe(d_model: int, max_len: int = 5) -> jnp.ndarray:
    """Deterministic sinusoidal positional-encoding table, shape (1, max_len, d_model)."""
    # The PyTorch module's interleaved assignment only works cleanly for even d_model.
    assert d_model % 2 == 0, "PositionalEncoding requires an even d_model"
    position = jnp.arange(0, max_len, dtype=jnp.float32)[:, None]             # (max_len, 1)
    div_term = jnp.exp(
        jnp.arange(0, d_model, 2, dtype=jnp.float32) * (-math.log(10000.0) / d_model)
    )                                                                          # (d_model//2,)
    angles = position * div_term                                               # (max_len, d_model//2)
    sin = jnp.sin(angles)
    cos = jnp.cos(angles)
    # Interleave so that pe[:, 0::2] = sin and pe[:, 1::2] = cos.
    pe = jnp.stack([sin, cos], axis=-1).reshape(max_len, d_model)
    return pe[None, :, :]                                                      # (1, max_len, d_model)


def precompute_pe_row(pe: jnp.ndarray, seq_len: int) -> jnp.ndarray:
    """Hoisted parameter prep: slice to seq_len and collapse to a (1, S*D) lane-dense row."""
    _, max_len, d_model = pe.shape
    assert seq_len <= max_len
    return pe[:, :seq_len, :].reshape(1, seq_len * d_model)


def _add_pe_kernel(x_ref, pe_ref, o_ref):
    # x_ref: (tile_b, tile_row) block; pe_ref: (1, tile_row) row (resident across the
    # batch grid axis). Broadcasted VPU add; lane-dense full-tile store.
    o_ref[...] = x_ref[...].astype(o_ref.dtype) + pe_ref[...].astype(o_ref.dtype)


def _sublane_multiple(dtype) -> int:
    bits = jnp.dtype(dtype).itemsize * 8
    return max(8, 256 // bits)   # 8 for 32-bit, 16 for 16-bit, 32 for 8-bit


def positional_encoding_forward(x: jnp.ndarray, pe_row: jnp.ndarray) -> jnp.ndarray:
    """x: (B, S, D); pe_row: (1, S*D) precomputed row.  Returns x + pe[:, :S, :]."""
    B, S, D = x.shape
    row = S * D
    assert pe_row.shape == (1, row)

    out_dtype = jnp.promote_types(x.dtype, pe_row.dtype)

    x2 = x.reshape(B, row)   # lane-dense 2-D view (free metadata op)

    x_item = jnp.dtype(x.dtype).itemsize
    pe_item = jnp.dtype(pe_row.dtype).itemsize
    out_item = jnp.dtype(out_dtype).itemsize
    widest = max(x_item, out_item)

    # --- lane-dim tiling: ~2 MiB blocks, multiples of 128 lanes ------------
    row_tile_target = (2 * 1024 * 1024) // widest        # elements per row tile
    if row <= row_tile_target or row % 128 != 0:
        tile_row = row                                    # full dim is always a legal block
    else:
        tile_row = max(128, (row_tile_target // 128) * 128)

    # --- sublane-dim tiling: full batch if it fits, else sublane-aligned ---
    sub = _sublane_multiple(x.dtype)
    block_bytes_target = 4 * 1024 * 1024
    rows_fit = max(1, block_bytes_target // (tile_row * widest))
    if B <= rows_fit or B <= sub:
        tile_b = B                                        # full dim is always a legal block
    else:
        tile_b = max(sub, (min(rows_fit, B) // sub) * sub)

    grid = (pl.cdiv(B, tile_b), pl.cdiv(row, tile_row))

    out2 = pl.pallas_call(
        _add_pe_kernel,
        out_shape=jax.ShapeDtypeStruct((B, row), out_dtype),
        grid=grid,
        in_specs=[
            pl.BlockSpec((tile_b, tile_row), lambda i, j: (i, j)),   # x rows
            pl.BlockSpec((1, tile_row), lambda i, j: (0, j)),        # pe row, resident over i
        ],
        out_specs=pl.BlockSpec((tile_b, tile_row), lambda i, j: (i, j)),
        compiler_params=pltpu.CompilerParams(
            dimension_semantics=("parallel", "parallel"),
            vmem_limit_bytes=32 * 1024 * 1024,
        ),
        cost_estimate=pl.CostEstimate(
            flops=B * row,
            transcendentals=0,
            bytes_accessed=B * row * (x_item + out_item) + row * pe_item,
        ),
    )(x2, pe_row)

    return out2.reshape(B, S, D)


if __name__ == "__main__":
    # Small shapes consistent with the module: max_len=5 => seq must be <= 5.
    batch, seq, d_model, max_len = 2, 4, 32, 5

    key = jax.random.PRNGKey(0)
    x = jax.random.normal(key, (batch, seq, d_model), dtype=jnp.float32)

    pe = build_pe(d_model, max_len)          # parameter setup (once)
    pe_row = precompute_pe_row(pe, seq)      # hoisted per-shape prep (once)

    ref = x + pe[:, :seq, :]                 # plain-JAX reference

    out = positional_encoding_forward(x, pe_row)
    out = jax.block_until_ready(out)

    assert out.shape == (batch, seq, d_model)
    assert out.dtype == ref.dtype
    assert jnp.allclose(out, ref, atol=1e-6, rtol=1e-6)

    print("KERNEL_OK")
</pallas_src>

<mosaic_0001>
module attributes {stable_mosaic.version = 11 : i64} {
  func.func @_add_pe_kernel(%arg0: i32, %arg1: i32, %arg2: memref<2x128xf32, #tpu.memory_space<vmem>>, %arg3: memref<1x128xf32, #tpu.memory_space<vmem>>, %arg4: memref<2x128xf32, #tpu.memory_space<vmem>>) attributes {dimension_semantics = [#tpu.dimension_semantics<parallel>, #tpu.dimension_semantics<parallel>], iteration_bounds = array<i64: 1, 1>, scalar_prefetch = 0 : i64, scratch_operands = 0 : i64, tpu.core_type = #tpu.core_type<tc>, window_params = [{transform_indices = @transform_0, window_bounds = array<i64: 2, 128>}, {transform_indices = @transform_1, window_bounds = array<i64: 1, 128>}, {transform_indices = @transform_2, window_bounds = array<i64: 2, 128>}]} {
    %c0 = arith.constant 0 : index
    %c0_0 = arith.constant 0 : index
    %0 = vector.load %arg2[%c0, %c0_0] : memref<2x128xf32, #tpu.memory_space<vmem>>, vector<2x128xf32>
    %c0_1 = arith.constant 0 : index
    %c0_2 = arith.constant 0 : index
    %1 = vector.load %arg3[%c0_1, %c0_2] : memref<1x128xf32, #tpu.memory_space<vmem>>, vector<1x128xf32>
    %2 = vector.broadcast %1 : vector<1x128xf32> to vector<2x128xf32>
    %3 = arith.addf %0, %2 : vector<2x128xf32>
    %c0_3 = arith.constant 0 : index
    %c0_4 = arith.constant 0 : index
    %4 = vector.load %arg4[%c0_3, %c0_4] : memref<2x128xf32, #tpu.memory_space<vmem>>, vector<2x128xf32>
    tpu.vector_store %arg4[%c0_3, %c0_4], %3 {strides = array<i32>} : memref<2x128xf32, #tpu.memory_space<vmem>>, vector<2x128xf32>,
    return
  }
  func.func @transform_0(%arg0: i32, %arg1: i32) -> (i32, i32) {
    %c0_i32 = arith.constant 0 : i32
    return %arg0, %arg1 : i32, i32
  }
  func.func @transform_1(%arg0: i32, %arg1: i32) -> (i32, i32) {
    %c0_i32 = arith.constant 0 : i32
    %c0_i32_0 = arith.constant 0 : i32
    return %c0_i32, %arg1 : i32, i32
  }
  func.func @transform_2(%arg0: i32, %arg1: i32) -> (i32, i32) {
    %c0_i32 = arith.constant 0 : i32
    return %arg0, %arg1 : i32, i32
  }
}

</mosaic_0001>

<bundles_post_ra>
// kernel: tpu_custom_call.1
= control target key start
LH: loop header
LB: loop body
LE: loop exit
PB: predicated region body
PF: predicated region fallthrough
CT: control target
= control target key end

     0   :  { %7 = vsyncpa [#allocation3], 0  ;;  %s144_s0 = inlined_call_operand.hbm [shape: f32[2,128], index: 0, kind: input, shape index: {}]   ;;  %s145_s1 = inlined_call_operand.vmem [shape: f32[1,128], index: 1, kind: input, shape index: {}]   ;;  %s146_s2 = inlined_call_operand.hbm [shape: f32[2,128], index: 2, kind: output, shape index: {}]  }
   0x1   :  { %8 = vsyncpa [#allocation4], 0  ;;  %s100_s9 = smov [#allocation2]   ;;  %s52_s13 = scalar_lea.hbm %s144_s0, 32 }
   0x2   :  { %s15_s10 = sshll.u32 %s100_s9, 4  ;;  %p53_p0 = scmp.ne.s32.totalorder %s144_s0, %s52_s13  ;;  %s16_s10 = int_to_ptr.vmem [resolvable:$true] %s15_s10 }
   0x3   :  { %p56_p1 = scmp.lt.u32.totalorder %s52_s13, %s144_s0 }
   0x5   :  { %p58_p2 = pnand %p56_p1, %p53_p0 }
   0x7   :  { %61 = shalt.err (!%p58_p2)
}
   0x8   :  { %s62_s18 = scalar_lea.vmem %s16_s10, 32  ;;  %p67_p4 = scmp.lt.s32.totalorder %s16_s10, %s16_s10 }
   0x9   :  { %p63_p3 = scmp.ne.s32.totalorder %s16_s10, %s62_s18  ;;  %p68_p5 = scmp.lt.s32.totalorder %s62_s18, %s62_s18 }
   0xb   :  { %p69_p6 = por %p68_p5, %p67_p4 }
   0xd   :  { %p70_p7 = pnand %p69_p6, %p63_p3 }
   0xf   :  { %73 = shalt.err (!%p70_p7)
}
  0x10   :  { %18 = dma.hbm_to_vmem [thread:$0]  %s144_s0, 32, %s16_s10, [#allocation3]  }
  0x11   :  { %96 = dma.done.wait [#allocation3], 32  }
  0x12   :  { %97 = vsyncadd [#allocation3], 4294967264  ;;  %s101_s21 = smov [#allocation5]   ;;  %v24_v0 = vld [vmem:[#allocation2] sm:$0x3] }
  0x13   :  { %s40_s22 = sshll.u32 %s101_s21, 4  ;;  %v49_v1 = vld [vmem:[%s145_s1] ss:$0 sm:$0xff]  ;;  %s41_s22 = int_to_ptr.vmem [resolvable:$true] %s40_s22 }
  0x14   :  { %v32_v2 = vadd.f32 %v49_v1, %v24_v0  ;;  %s74_s25 = scalar_lea.vmem %s41_s22, 32  ;;  %p79_p9 = scmp.lt.s32.totalorder %s41_s22, %s41_s22 }
  0x15   :  { %p75_p8 = scmp.ne.s32.totalorder %s41_s22, %s74_s25  ;;  %p80_p10 = scmp.lt.s32.totalorder %s74_s25, %s74_s25 }
  0x16   :  { %33 = vst [vmem:[#allocation5] sm:$0x3] %v32_v2 }
  0x17   :  { %p81_p11 = por %p80_p10, %p79_p9 }
  0x19   :  { %p82_p12 = pnand %p81_p11, %p75_p8 }
  0x1b   :  { %85 = shalt.err (!%p82_p12)
}
  0x1c   :  { %s86_s27 = scalar_lea.hbm %s146_s2, 32 }
  0x1d   :  { %p87_p13 = scmp.ne.s32.totalorder %s146_s2, %s86_s27  ;;  %p90_p0 = scmp.lt.u32.totalorder %s86_s27, %s146_s2 }
  0x1f   :  { %p92_p1 = pnand %p90_p0, %p87_p13 }
  0x21   :  { %95 = shalt.err (!%p92_p1)
}
  0x22   :  { %43 = dma.vmem_to_hbm [thread:$0]  %s41_s22, 32, %s146_s2, [#allocation4]  }
  0x23   :  { %98 = dma.done.wait [#allocation4], 32  }
  0x24   :  { %99 = vsyncadd [#allocation4], 4294967264 }
  0x25   :  { %47 = vsyncpa [#allocation3], 1 }
  0x26   :  { %48 = vsyncpa [#allocation4], 1 }

</bundles_post_ra>
